<compile_context>
chip_gen: v7x
topology: tpu7x:2x2x1
jax: 0.10.0
libtpu: 0.0.40
codegen_flags: <defaults>
</compile_context>

<pallas_src>
import functools

import jax
import jax.numpy as jnp
from jax.experimental import pallas as pl
from jax.experimental.pallas import tpu as pltpu

_LANES = 128


# ----------------------------- device helpers -------------------------------

def _device_kind() -> str:
    try:
        return jax.devices()[0].device_kind.lower()
    except Exception:
        return ""


def _target_block_bytes() -> int:
    kind = _device_kind()
    if ("v6" in kind) or ("v7" in kind):
        # 32 MiB default scoped VMEM: 4 MiB blocks -> 16 MiB with in+out
        # double-buffered, comfortable headroom.
        return 4 * 1024 * 1024
    # v5e (16 MiB default scoped VMEM) and conservative default:
    # 2 MiB blocks -> 8 MiB pipelined, already >= ~90% of HBM roofline.
    return 2 * 1024 * 1024


def _compute_dtype(dtype):
    if dtype == jnp.bfloat16:
        kind = _device_kind()
        if ("v6" in kind) or ("v7" in kind):
            return jnp.bfloat16  # native bf16 VALU; halves vreg pressure
    return jnp.float32


# ----------------------------- Pallas kernel --------------------------------

def _hswish_kernel(x_ref, o_ref, *, compute_dtype):
    # x_ref / o_ref: (tm, 128) lane-dense tiles.
    x = x_ref[...].astype(compute_dtype)
    # relu6(x + 3) == clip(x + 3, 0, 6); multiply by 1/6 instead of dividing.
    y = x * jnp.clip(x + 3.0, 0.0, 6.0) * (1.0 / 6.0)
    o_ref[...] = y.astype(o_ref.dtype)


# ------------------------------- wrapper -------------------------------------

def hswish(x, *, min_pallas_size=0):
    """Elementwise h-swish on an arbitrary-shaped array via a Pallas kernel.

    min_pallas_size: if the element count is below this, fall back to a plain
    fused-XLA expression (useful for tiny activations where launch/DMA setup
    dominates). Default 0 = always use the Pallas kernel.
    """
    orig_shape = x.shape
    orig_dtype = x.dtype
    n = x.size

    if n == 0:
        return x
    if n < min_pallas_size:
        return (x * jnp.clip(x + 3.0, 0.0, 6.0) / 6.0).astype(orig_dtype)

    flat = x.reshape(-1)
    rows = pl.cdiv(n, _LANES)

    # Pad only to the 128-lane boundary (never to a tile multiple): the ragged
    # last *block* is masked by Pallas, so tile alignment costs no extra HBM
    # passes. hswish(0) == 0, so zero padding is numerically inert.
    padded = (rows * _LANES) != n
    if padded:
        flat = jnp.pad(flat, (0, rows * _LANES - n))
    x2d = flat.reshape(rows, _LANES)

    itemsize = jnp.dtype(orig_dtype).itemsize
    # Row-tile cap sized against the per-generation VMEM budget; multiple of 32
    # rows so f32/bf16/int8 sublane-packing constraints are all satisfied.
    tm_max = max(32, (_target_block_bytes() // (_LANES * itemsize)) // 32 * 32)

    if rows > tm_max:
        tm = tm_max
    elif rows > 2048:
        # Force >= 2 grid steps so the "parallel" axis can shard across both
        # TensorCores on v7x (harmless on single-TC v5e/v6e).
        tm = (-(-((rows + 1) // 2) // 8)) * 8
    else:
        tm = rows  # whole array in one block (full-extent block is legal)

    grid = (pl.cdiv(rows, tm),)

    kernel = functools.partial(
        _hswish_kernel, compute_dtype=_compute_dtype(orig_dtype))

    cost = pl.CostEstimate(
        flops=5 * n,                       # add + clip(2) + 2 muls per element
        transcendentals=0,
        bytes_accessed=2 * n * itemsize,   # one read + one write pass
    )

    out2d = pl.pallas_call(
        kernel,
        out_shape=jax.ShapeDtypeStruct((rows, _LANES), orig_dtype),
        grid_spec=pltpu.PrefetchScalarGridSpec(
            num_scalar_prefetch=0,
            grid=grid,
            in_specs=[pl.BlockSpec((tm, _LANES), lambda i: (i, 0))],
            out_specs=pl.BlockSpec((tm, _LANES), lambda i: (i, 0)),
        ),
        compiler_params=pltpu.CompilerParams(
            dimension_semantics=("parallel",)),
        cost_estimate=cost,
    )(x2d)

    out_flat = out2d.reshape(-1)
    if padded:
        out_flat = out_flat[:n]
    return out_flat.reshape(orig_shape)


# ------------------------------ reference ------------------------------------

def _ref_hswish(x):
    return x * jnp.clip(x + 3.0, 0.0, 6.0) / 6.0


# --------------------------------- main ---------------------------------------

if __name__ == "__main__":
    key = jax.random.PRNGKey(0)
    k1, k2 = jax.random.split(key)

    # Small NCHW activation, consistent with the module's typical use.
    x_aligned = 3.5 * jax.random.normal(k1, (2, 4, 16, 16), dtype=jnp.float32)
    # 128-unaligned element count: exercises the pad + ragged-block path.
    x_ragged = 3.5 * jax.random.normal(k2, (2, 3, 17, 13), dtype=jnp.float32)

    for x in (x_aligned, x_ragged):
        out = jax.block_until_ready(hswish(x))
        ref = jax.block_until_ready(_ref_hswish(x))
        assert out.shape == x.shape
        assert out.dtype == x.dtype
        assert jnp.allclose(out, ref, atol=1e-6, rtol=1e-6), "mismatch vs reference"

    print("KERNEL_OK")
</pallas_src>

<mosaic_0001>
module attributes {stable_mosaic.version = 11 : i64} {
  func.func @_hswish_kernel(%arg0: i32, %arg1: memref<16x128xf32, #tpu.memory_space<vmem>>, %arg2: memref<16x128xf32, #tpu.memory_space<vmem>>) attributes {dimension_semantics = [#tpu.dimension_semantics<parallel>], iteration_bounds = array<i64: 1>, scalar_prefetch = 0 : i64, scratch_operands = 0 : i64, tpu.core_type = #tpu.core_type<tc>, window_params = [{transform_indices = @transform_0, window_bounds = array<i64: 16, 128>}, {transform_indices = @transform_1, window_bounds = array<i64: 16, 128>}]} {
    %c0 = arith.constant 0 : index
    %c0_0 = arith.constant 0 : index
    %0 = vector.load %arg1[%c0, %c0_0] : memref<16x128xf32, #tpu.memory_space<vmem>>, vector<16x128xf32>
    %cst = arith.constant 3.000000e+00 : f32
    %1 = vector.broadcast %cst : f32 to vector<16x128xf32>
    %2 = arith.addf %0, %1 : vector<16x128xf32>
    %cst_1 = arith.constant 0.000000e+00 : f32
    %cst_2 = arith.constant 6.000000e+00 : f32
    %3 = vector.broadcast %cst_1 : f32 to vector<16x128xf32>
    %4 = arith.maximumf %3, %2 : vector<16x128xf32>
    %5 = vector.broadcast %cst_2 : f32 to vector<16x128xf32>
    %6 = arith.minimumf %5, %4 : vector<16x128xf32>
    %7 = arith.mulf %0, %6 : vector<16x128xf32>
    %cst_3 = arith.constant 0.166666672 : f32
    %8 = vector.broadcast %cst_3 : f32 to vector<16x128xf32>
    %9 = arith.mulf %7, %8 : vector<16x128xf32>
    %c0_4 = arith.constant 0 : index
    %c0_5 = arith.constant 0 : index
    %10 = vector.load %arg2[%c0_4, %c0_5] : memref<16x128xf32, #tpu.memory_space<vmem>>, vector<16x128xf32>
    tpu.vector_store %arg2[%c0_4, %c0_5], %9 {strides = array<i32>} : memref<16x128xf32, #tpu.memory_space<vmem>>, vector<16x128xf32>,
    return
  }
  func.func @transform_0(%arg0: i32) -> (i32, i32) {
    %c0_i32 = arith.constant 0 : i32
    %c0_i32_0 = arith.constant 0 : i32
    return %arg0, %c0_i32 : i32, i32
  }
  func.func @transform_1(%arg0: i32) -> (i32, i32) {
    %c0_i32 = arith.constant 0 : i32
    %c0_i32_0 = arith.constant 0 : i32
    return %arg0, %c0_i32 : i32, i32
  }
}

</mosaic_0001>

<bundles_post_ra>
// kernel: tpu_custom_call.1
= control target key start
LH: loop header
LB: loop body
LE: loop exit
PB: predicated region body
PF: predicated region fallthrough
CT: control target
= control target key end

     0   :  { %6 = vsyncpa [#allocation3], 0  ;;  %s150_s0 = inlined_call_operand.hbm [shape: f32[16,128], index: 0, kind: input, shape index: {}]   ;;  %s151_s1 = inlined_call_operand.hbm [shape: f32[16,128], index: 1, kind: output, shape index: {}]  }
   0x1   :  { %7 = vsyncpa [#allocation4], 0  ;;  %s106_s6 = smov [#allocation2]   ;;  %s58_s10 = scalar_lea.hbm %s150_s0, 256 }
   0x2   :  { %s13_s7 = sshll.u32 %s106_s6, 4  ;;  %p59_p0 = scmp.ne.s32.totalorder %s150_s0, %s58_s10  ;;  %s14_s7 = int_to_ptr.vmem [resolvable:$true] %s13_s7 }
   0x3   :  { %p62_p1 = scmp.lt.u32.totalorder %s58_s10, %s150_s0 }
   0x5   :  { %p64_p2 = pnand %p62_p1, %p59_p0 }
   0x7   :  { %67 = shalt.err (!%p64_p2)
}
   0x8   :  { %s68_s15 = scalar_lea.vmem %s14_s7, 256  ;;  %p73_p4 = scmp.lt.s32.totalorder %s14_s7, %s14_s7 }
   0x9   :  { %p69_p3 = scmp.ne.s32.totalorder %s14_s7, %s68_s15  ;;  %p74_p5 = scmp.lt.s32.totalorder %s68_s15, %s68_s15 }
   0xb   :  { %p75_p6 = por %p74_p5, %p73_p4 }
   0xd   :  { %p76_p7 = pnand %p75_p6, %p69_p3 }
   0xf   :  { %79 = shalt.err (!%p76_p7)
}
  0x10   :  { %s107_s16 = smov 128   ;;  %s108_s17 = smov 8  }
  0x11   :  { %19 = dma.hbm_to_vmem [thread:$0]  %s150_s0, 256, %s14_s7, [#allocation3], %s107_s16, %s107_s16, %s108_s17  }
  0x12   :  { %102 = dma.done.wait [#allocation3], 256  }
  0x13   :  { %103 = vsyncadd [#allocation3], 4294967040  ;;  %v23_v0 = vld [vmem:[#allocation2] sm:$0xff]  ;;  %v24_v1 = vld [vmem:[#allocation2 + $0x8] sm:$0xff]  ;;  %s109_s20 = smov [#allocation5]  }
  0x14   :  { %v25_v2 = vadd.f32 3.0, %v23_v0  ;;  %v26_v3 = vadd.f32 3.0, %v24_v1  ;;  %s42_s21 = sshll.u32 %s109_s20, 4  ;;  %s43_s21 = int_to_ptr.vmem [resolvable:$true] %s42_s21 }
  0x15   :  { %s80_s0 = scalar_lea.vmem %s43_s21, 256  ;;  %p85_p9 = scmp.lt.s32.totalorder %s43_s21, %s43_s21 }
  0x16   :  { %v27_v4 = vmax.f32 %v25_v2, 0.0  ;;  %v28_v5 = vmax.f32 %v26_v3, 0.0  ;;  %p81_p8 = scmp.ne.s32.totalorder %s43_s21, %s80_s0  ;;  %p86_p10 = scmp.lt.s32.totalorder %s80_s0, %s80_s0 }
  0x18   :  { %v29_v6 = vmin.f32 %v27_v4, 6.0  ;;  %v30_v7 = vmin.f32 %v28_v5, 6.0  ;;  %p87_p11 = por %p86_p10, %p85_p9 }
  0x1a   :  { %v31_v8 = vmul.f32 %v29_v6, %v23_v0  ;;  %v32_v9 = vmul.f32 %v30_v7, %v24_v1  ;;  %p88_p12 = pnand %p87_p11, %p81_p8 }
  0x1c   :  { %v33_v10 = vmul.f32 0.16666667, %v31_v8  ;;  %v34_v11 = vmul.f32 0.16666667, %v32_v9 }
  0x1e   :  { %35 = vst [vmem:[#allocation5] sm:$0xff] %v33_v10  ;;  %36 = vst [vmem:[#allocation5 + $0x8] sm:$0xff] %v34_v11 }
  0x1f   :  { %91 = shalt.err (!%p88_p12)
}
  0x20   :  { %s92_s24 = scalar_lea.hbm %s151_s1, 256 }
  0x21   :  { %p93_p13 = scmp.ne.s32.totalorder %s151_s1, %s92_s24  ;;  %p96_p0 = scmp.lt.u32.totalorder %s92_s24, %s151_s1 }
  0x23   :  { %p98_p1 = pnand %p96_p0, %p93_p13 }
  0x25   :  { %101 = shalt.err (!%p98_p1)
}
  0x26   :  { %48 = dma.vmem_to_hbm [thread:$0]  %s43_s21, 256, %s151_s1, [#allocation4], %s107_s16, %s107_s16, %s108_s17  }
  0x27   :  { %104 = dma.done.wait [#allocation4], 256  }
  0x28   :  { %105 = vsyncadd [#allocation4], 4294967040 }
  0x29   :  { %52 = vsyncpa [#allocation3], 1 }
  0x2a   :  { %53 = vsyncpa [#allocation4], 1 }

</bundles_post_ra>
